<compile_context>
chip_gen: v6e
topology: v6e:2x2x1
jax: 0.10.0
libtpu: 0.0.40
codegen_flags: <defaults>
</compile_context>

<pallas_src>
import functools

import jax
import jax.numpy as jnp
from jax.experimental import pallas as pl
from jax.experimental.pallas import tpu as pltpu

LN_EPS = 1e-5              # PyTorch nn.LayerNorm default
_MXU_DTYPE = jnp.bfloat16  # MXU operand dtype (f32 matmul is emulated / slow)
_TARGET_STEP_BYTES = 6 << 20   # ~6 MiB HBM round trip per grid step


def _patch_merge_kernel(a_ref, b_ref, wg_ref, bias_ref, o_ref, *, inv_c4):
    """Fused 2x2-merge + LayerNorm(4C) + Linear(4C->2C, no bias) on a row tile.

    a_ref   : (th, Wh, 2C)  even-h rows  -> features [x0 | x2]  (parity squeezed)
    b_ref   : (th, Wh, 2C)  odd-h  rows  -> features [x1 | x3]
    wg_ref  : (4C, 2C) bf16  gamma-folded W.T, rows ordered [x0, x2, x1, x3]
    bias_ref: (1, 2C)  f32   beta @ W.T
    o_ref   : (th, Wh, 2C)
    """
    a = a_ref[...].astype(jnp.float32)        # (th, Wh, 2C)
    b = b_ref[...].astype(jnp.float32)        # (th, Wh, 2C)

    # One-pass LayerNorm stats over the full 4C feature; only two cross-lane
    # reduces (XLU) — the a+b / a*a+b*b adds ride on the VALU.
    s = jnp.sum(a + b, axis=-1, keepdims=True)
    ss = jnp.sum(a * a + b * b, axis=-1, keepdims=True)
    mean = s * inv_c4
    # Clamp: padded boundary rows (non-divisible R) may see tiny negative var.
    var = jnp.maximum(ss * inv_c4 - mean * mean, 0.0)
    rstd = jax.lax.rsqrt(var + LN_EPS)

    mxu_dt = wg_ref.dtype
    an = ((a - mean) * rstd).astype(mxu_dt)   # gamma/beta folded into wg/bias
    bn = ((b - mean) * rstd).astype(mxu_dt)

    # Single K=4C dot on the MXU (256-deep on v6e/v7x), f32 accumulation.
    xn = jnp.concatenate([an, bn], axis=-1)   # (th, Wh, 4C), lane concat
    y = jnp.einsum("rwk,kd->rwd", xn, wg_ref[...],
                   preferred_element_type=jnp.float32)
    o_ref[...] = (y + bias_ref[...]).astype(o_ref.dtype)


def _vmem_capacity_bytes():
    """Physical VMEM per TensorCore; conservative fallback = v7x (64 MiB)."""
    try:
        return int(pltpu.get_tpu_info().vmem_capacity_bytes)
    except Exception:
        return 64 << 20


def _pick_tile_rows(R, row_traffic_bytes, row_vmem_bytes, vmem_budget):
    """Rows of the (B*H/2) axis handled per grid step.

    Target ~_TARGET_STEP_BYTES of HBM round trip per step (keeps the ~0.35us
    fixed per-step overhead below ~10% of the DMA time), capped by the VMEM
    budget, and keep the grid step count even so both v7x TensorCores get an
    equal share under dimension_semantics=("parallel",).
    """
    th_vmem = max(1, vmem_budget // row_vmem_bytes)
    th_tgt = max(1, _TARGET_STEP_BYTES // row_traffic_bytes)
    th = max(1, min(R, th_tgt, th_vmem))
    steps = pl.cdiv(R, th)
    if steps == 1 and R >= 2:
        steps = 2
    elif steps % 2 == 1:
        steps += 1
    th = min(th, max(1, pl.cdiv(R, steps)))
    return int(th)


def _fused_patch_merge(xr, wg, bias_row):
    """xr: (R, 2, Wh, 2C), wg: (4C, 2C) bf16, bias_row: (1, 2C) f32 -> (R, Wh, 2C)."""
    R, _, Wh, C2 = xr.shape
    C4 = 2 * C2
    in_bytes = xr.dtype.itemsize
    out_dtype = xr.dtype
    out_bytes = jnp.dtype(out_dtype).itemsize

    cap = _vmem_capacity_bytes()
    vmem_limit = int((cap * 7) // 8)
    # Resident operands (double-buffered by BlockSpec even though constant).
    resident = 2 * (C4 * C2 * wg.dtype.itemsize) + 2 * (C2 * 4)
    budget = max(1 << 20, int((vmem_limit - resident) * 0.7))

    # Per-output-pixel costs.
    traffic_px = 2 * C2 * in_bytes + C2 * out_bytes            # HBM round trip
    vmem_px = (2 * 2 * C2 * in_bytes                           # a,b double-buffered
               + 2 * C2 * out_bytes                            # out double-buffered
               + 4 * C2 * 4                                    # f32 a, b, an, bn
               + C4 * 2                                        # bf16 xn operand
               + C2 * 4)                                       # f32 accumulator
    th = _pick_tile_rows(R, Wh * traffic_px, Wh * vmem_px, budget)
    grid = (pl.cdiv(R, th),)   # non-divisible R: boundary stores are masked

    kernel = functools.partial(_patch_merge_kernel, inv_c4=1.0 / C4)

    # NOTE: a single row-strip (Wh*4C) exceeding the VMEM budget would need an
    # extra tile dimension along Wh; not required for typical Swin stages.
    return pl.pallas_call(
        kernel,
        out_shape=jax.ShapeDtypeStruct((R, Wh, C2), out_dtype),
        grid_spec=pltpu.PrefetchScalarGridSpec(
            num_scalar_prefetch=0,
            grid=grid,
            in_specs=[
                # h-parity dim squeezed: kernel refs are (th, Wh, 2C) views.
                pl.BlockSpec((th, pl.Squeezed(), Wh, C2),
                             lambda i: (i, 0, 0, 0)),   # dh=0 -> [x0 | x2]
                pl.BlockSpec((th, pl.Squeezed(), Wh, C2),
                             lambda i: (i, 1, 0, 0)),   # dh=1 -> [x1 | x3]
                pl.BlockSpec((C4, C2), lambda i: (0, 0)),   # wg (resident)
                pl.BlockSpec((1, C2), lambda i: (0, 0)),    # bias row (resident)
            ],
            out_specs=pl.BlockSpec((th, Wh, C2), lambda i: (i, 0, 0)),
        ),
        compiler_params=pltpu.CompilerParams(
            dimension_semantics=("parallel",),
            vmem_limit_bytes=vmem_limit,
        ),
    )(xr, xr, wg, bias_row)


def patch_merging_forward(x, w_reduction, ln_gamma, ln_beta):
    """PatchMerging forward.

    x:           (B, H, W, C)      f32 or bf16
    w_reduction: (2C, 4C)          torch nn.Linear weight layout
    ln_gamma:    (4C,)
    ln_beta:     (4C,)
    returns:     (B, H//2, W//2, 2C) in x.dtype
    """
    B, H, W, C = x.shape
    assert H % 2 == 0 and W % 2 == 0, f"x size ({H}*{W}) are not even."
    Hh, Wh = H // 2, W // 2
    C2 = 2 * C
    R = B * Hh

    # Free (metadata-only, row-major) reshape: (B, H, W, C) -> (B*Hh, 2, Wh, 2C)
    # dim 1 is the h-parity; the last dim packs [w-even | w-odd] * C.
    xr = x.reshape(R, 2, Wh, C2)

    # torch: y = ((xc - mean) * rstd * gamma + beta) @ W.T
    #          = ((xc - mean) * rstd) @ (gamma[:, None] * W.T)  +  beta @ W.T
    w_t = jnp.transpose(w_reduction).astype(jnp.float32)          # (4C, 2C)
    g = ln_gamma.astype(jnp.float32)
    bt = ln_beta.astype(jnp.float32)
    wg_t = g[:, None] * w_t                                       # gamma folded
    bias_row = (bt @ w_t).reshape(1, C2)                          # beta folded, f32
    # Permute rows from torch concat order [x0, x1, x2, x3] to the kernel's
    # packing [x0, x2, x1, x3]; cast the resident weight to bf16 once.
    wg = jnp.concatenate(
        [wg_t[0:C], wg_t[2 * C:3 * C], wg_t[C:2 * C], wg_t[3 * C:4 * C]],
        axis=0).astype(_MXU_DTYPE)                                # (4C, 2C)

    y3 = _fused_patch_merge(xr, wg, bias_row)                     # (R, Wh, 2C)
    return y3.reshape(B, Hh, Wh, C2)


def _reference_forward(x, w_reduction, ln_gamma, ln_beta):
    """Pure-JAX f32 reference mirroring the torch module."""
    x0 = x[:, 0::2, 0::2, :]
    x1 = x[:, 1::2, 0::2, :]
    x2 = x[:, 0::2, 1::2, :]
    x3 = x[:, 1::2, 1::2, :]
    xc = jnp.concatenate([x0, x1, x2, x3], axis=-1).astype(jnp.float32)
    mean = jnp.mean(xc, axis=-1, keepdims=True)
    var = jnp.mean((xc - mean) ** 2, axis=-1, keepdims=True)
    xn = (xc - mean) / jnp.sqrt(var + LN_EPS)
    xn = xn * ln_gamma.astype(jnp.float32) + ln_beta.astype(jnp.float32)
    return jnp.einsum("bhwc,oc->bhwo", xn, w_reduction.astype(jnp.float32))


if __name__ == "__main__":
    key = jax.random.PRNGKey(0)
    kx, kw, kg, kb = jax.random.split(key, 4)

    # Small shapes consistent with the module; dim=64 keeps 2C=128 lane-dense.
    B, H, W, C = 2, 16, 16, 64
    x = jax.random.normal(kx, (B, H, W, C), dtype=jnp.float32)
    w_reduction = jax.random.normal(kw, (2 * C, 4 * C), dtype=jnp.float32) * 0.02
    ln_gamma = 1.0 + 0.1 * jax.random.normal(kg, (4 * C,), dtype=jnp.float32)
    ln_beta = 0.1 * jax.random.normal(kb, (4 * C,), dtype=jnp.float32)

    fwd = jax.jit(patch_merging_forward)
    out = jax.block_until_ready(fwd(x, w_reduction, ln_gamma, ln_beta))

    ref = _reference_forward(x, w_reduction, ln_gamma, ln_beta)
    assert out.shape == (B, H // 2, W // 2, 2 * C), out.shape
    outf = out.astype(jnp.float32)
    max_err = float(jnp.max(jnp.abs(outf - ref)))
    # bf16 MXU operands (gamma folded into the bf16 weight) => looser tolerance
    # than the pure-f32 matmul reference.
    assert jnp.allclose(outf, ref, atol=2e-2, rtol=2e-2), max_err

    print("KERNEL_OK")
</pallas_src>

<mosaic_0001>
module attributes {stable_mosaic.version = 11 : i64} {
  func.func @_patch_merge_kernel(%arg0: i32, %arg1: memref<8x1x8x128xf32, #tpu.memory_space<vmem>>, %arg2: memref<8x1x8x128xf32, #tpu.memory_space<vmem>>, %arg3: memref<256x128xbf16, #tpu.memory_space<vmem>>, %arg4: memref<1x128xf32, #tpu.memory_space<vmem>>, %arg5: memref<8x8x128xf32, #tpu.memory_space<vmem>>) attributes {dimension_semantics = [#tpu.dimension_semantics<parallel>], iteration_bounds = array<i64: 2>, scalar_prefetch = 0 : i64, scratch_operands = 0 : i64, tpu.core_type = #tpu.core_type<tc>, window_params = [{transform_indices = @transform_0, window_bounds = array<i64: 8, 1, 8, 128>}, {transform_indices = @transform_1, window_bounds = array<i64: 8, 1, 8, 128>}, {pipeline_mode = #tpu.pipeline_mode<synchronous>, transform_indices = @transform_2, window_bounds = array<i64: 256, 128>}, {pipeline_mode = #tpu.pipeline_mode<synchronous>, transform_indices = @transform_3, window_bounds = array<i64: 1, 128>}, {transform_indices = @transform_4, window_bounds = array<i64: 8, 8, 128>}]} {
    %c0 = arith.constant 0 : index
    %c0_0 = arith.constant 0 : index
    %c0_1 = arith.constant 0 : index
    %c0_2 = arith.constant 0 : index
    %0 = vector.load %arg1[%c0, %c0_0, %c0_1, %c0_2] : memref<8x1x8x128xf32, #tpu.memory_space<vmem>>, vector<8x1x8x128xf32>
    %1 = vector.shape_cast %0 : vector<8x1x8x128xf32> to vector<8x8x128xf32>
    %c0_3 = arith.constant 0 : index
    %c0_4 = arith.constant 0 : index
    %c0_5 = arith.constant 0 : index
    %c0_6 = arith.constant 0 : index
    %2 = vector.load %arg2[%c0_3, %c0_4, %c0_5, %c0_6] : memref<8x1x8x128xf32, #tpu.memory_space<vmem>>, vector<8x1x8x128xf32>
    %3 = vector.shape_cast %2 : vector<8x1x8x128xf32> to vector<8x8x128xf32>
    %4 = arith.addf %1, %3 : vector<8x8x128xf32>
    %cst = arith.constant dense<0.000000e+00> : vector<8x8xf32>
    %5 = vector.multi_reduction <add>, %4, %cst [2] : vector<8x8x128xf32> to vector<8x8xf32>
    %6 = vector.shape_cast %5 : vector<8x8xf32> to vector<8x8x1xf32>
    %7 = arith.mulf %1, %1 : vector<8x8x128xf32>
    %8 = arith.mulf %3, %3 : vector<8x8x128xf32>
    %9 = arith.addf %7, %8 : vector<8x8x128xf32>
    %cst_7 = arith.constant dense<0.000000e+00> : vector<8x8xf32>
    %10 = vector.multi_reduction <add>, %9, %cst_7 [2] : vector<8x8x128xf32> to vector<8x8xf32>
    %11 = vector.shape_cast %10 : vector<8x8xf32> to vector<8x8x1xf32>
    %cst_8 = arith.constant 3.906250e-03 : f32
    %12 = vector.broadcast %cst_8 : f32 to vector<8x8x1xf32>
    %13 = arith.mulf %6, %12 : vector<8x8x1xf32>
    %cst_9 = arith.constant 3.906250e-03 : f32
    %14 = vector.broadcast %cst_9 : f32 to vector<8x8x1xf32>
    %15 = arith.mulf %11, %14 : vector<8x8x1xf32>
    %16 = arith.mulf %13, %13 : vector<8x8x1xf32>
    %17 = arith.subf %15, %16 : vector<8x8x1xf32>
    %cst_10 = arith.constant 0.000000e+00 : f32
    %18 = vector.broadcast %cst_10 : f32 to vector<8x8x1xf32>
    %19 = arith.maximumf %17, %18 : vector<8x8x1xf32>
    %cst_11 = arith.constant 9.99999974E-6 : f32
    %20 = vector.broadcast %cst_11 : f32 to vector<8x8x1xf32>
    %21 = arith.addf %19, %20 : vector<8x8x1xf32>
    %22 = math.rsqrt %21 : vector<8x8x1xf32>
    %23 = vector.broadcast %13 : vector<8x8x1xf32> to vector<8x8x128xf32>
    %24 = arith.subf %1, %23 : vector<8x8x128xf32>
    %25 = vector.broadcast %22 : vector<8x8x1xf32> to vector<8x8x128xf32>
    %26 = arith.mulf %24, %25 : vector<8x8x128xf32>
    %27 = arith.truncf %26 : vector<8x8x128xf32> to vector<8x8x128xbf16>
    %28 = vector.broadcast %13 : vector<8x8x1xf32> to vector<8x8x128xf32>
    %29 = arith.subf %3, %28 : vector<8x8x128xf32>
    %30 = vector.broadcast %22 : vector<8x8x1xf32> to vector<8x8x128xf32>
    %31 = arith.mulf %29, %30 : vector<8x8x128xf32>
    %32 = arith.truncf %31 : vector<8x8x128xf32> to vector<8x8x128xbf16>
    %33 = tpu.concatenate %27, %32 in 2 : vector<8x8x128xbf16>, vector<8x8x128xbf16> -> vector<8x8x256xbf16>
    %c0_12 = arith.constant 0 : index
    %c0_13 = arith.constant 0 : index
    %34 = vector.load %arg3[%c0_12, %c0_13] : memref<256x128xbf16, #tpu.memory_space<vmem>>, vector<256x128xbf16>
    "tpu.trace_start"() <{level = 10 : i32, message = "rwk,kd->rwd"}> : () -> ()
    %cst_14 = arith.constant dense<0.000000e+00> : vector<8x8x128xf32>
    %35 = tpu.matmul %33, %34, %cst_14 {dimension_numbers = #tpu.dot_dimension_numbers<[2], [0], [0, 1], [1], [0, 0, 0, 1, 1, 1], [], []>} : vector<8x8x256xbf16>, vector<256x128xbf16>, vector<8x8x128xf32> -> vector<8x8x128xf32>
    "tpu.trace_stop"() : () -> ()
    %c0_15 = arith.constant 0 : index
    %c0_16 = arith.constant 0 : index
    %36 = vector.load %arg4[%c0_15, %c0_16] : memref<1x128xf32, #tpu.memory_space<vmem>>, vector<1x128xf32>
    %37 = vector.shape_cast %36 : vector<1x128xf32> to vector<1x1x128xf32>
    %38 = vector.broadcast %37 : vector<1x1x128xf32> to vector<8x8x128xf32>
    %39 = arith.addf %35, %38 : vector<8x8x128xf32>
    %c0_17 = arith.constant 0 : index
    %c0_18 = arith.constant 0 : index
    %c0_19 = arith.constant 0 : index
    %40 = vector.load %arg5[%c0_17, %c0_18, %c0_19] : memref<8x8x128xf32, #tpu.memory_space<vmem>>, vector<8x8x128xf32>
    tpu.vector_store %arg5[%c0_17, %c0_18, %c0_19], %39 {strides = array<i32>} : memref<8x8x128xf32, #tpu.memory_space<vmem>>, vector<8x8x128xf32>,
    return
  }
  func.func @transform_0(%arg0: i32) -> (i32, i32, i32, i32) {
    %c0_i32 = arith.constant 0 : i32
    %c0_i32_0 = arith.constant 0 : i32
    %c0_i32_1 = arith.constant 0 : i32
    %c0_i32_2 = arith.constant 0 : i32
    return %arg0, %c0_i32, %c0_i32_0, %c0_i32_1 : i32, i32, i32, i32
  }
  func.func @transform_1(%arg0: i32) -> (i32, i32, i32, i32) {
    %c1_i32 = arith.constant 1 : i32
    %c0_i32 = arith.constant 0 : i32
    %c0_i32_0 = arith.constant 0 : i32
    %c0_i32_1 = arith.constant 0 : i32
    return %arg0, %c1_i32, %c0_i32, %c0_i32_0 : i32, i32, i32, i32
  }
  func.func @transform_2(%arg0: i32) -> (i32, i32) {
    %c0_i32 = arith.constant 0 : i32
    %c0_i32_0 = arith.constant 0 : i32
    %c0_i32_1 = arith.constant 0 : i32
    return %c0_i32, %c0_i32_0 : i32, i32
  }
  func.func @transform_3(%arg0: i32) -> (i32, i32) {
    %c0_i32 = arith.constant 0 : i32
    %c0_i32_0 = arith.constant 0 : i32
    %c0_i32_1 = arith.constant 0 : i32
    return %c0_i32, %c0_i32_0 : i32, i32
  }
  func.func @transform_4(%arg0: i32) -> (i32, i32, i32) {
    %c0_i32 = arith.constant 0 : i32
    %c0_i32_0 = arith.constant 0 : i32
    %c0_i32_1 = arith.constant 0 : i32
    return %arg0, %c0_i32, %c0_i32_0 : i32, i32, i32
  }
}

</mosaic_0001>

<bundles_post_ra>
// kernel: patch_merging_forward.1
= control target key start
LH: loop header
LB: loop body
LE: loop exit
PB: predicated region body
PF: predicated region fallthrough
CT: control target
= control target key end

     0   :  { %9 = vsyncpa [#allocation5], 0  ;;  %s1531_s0 = inlined_call_operand.vmem [shape: f32[16,2,8,128], index: 0, kind: input, shape index: {}, may-alias: {0,1}]   ;;  %s1532_s1 = inlined_call_operand.vmem [shape: f32[16,2,8,128], index: 1, kind: input, shape index: {}, may-alias: {0,1}]   ;;  %s1533_s2 = inlined_call_operand.vmem [shape: bf16[256,128], index: 2, kind: input, shape index: {}]   ;;  %s1534_s3 = inlined_call_operand.vmem [shape: f32[1,128], index: 3, kind: input, shape index: {}]   ;;  %s1535_s4 = inlined_call_operand.hbm [shape: f32[16,8,128], index: 4, kind: output, shape index: {}]  }
   0x1   :  { %11 = vsyncpa [#allocation5 + $0x1], 0  ;;  %s1176_s15 = smov 0   ;;  %s1178_s16 = smov 0  }
   0x2   :  { %s1180_s17 = smov 0   ;;  %s1182_s18 = smov 0  }
   0x3 LB: > { %s892_s19 = sadd.s32 4294967295, %s1146_s18   ;;  %s893_s20 = sadd.s32 4294967294, %s1146_s18   ;;  %s1146_s18 = sphi %s1182_s18, %s1542_s18   ;;  %s1142_s17 = sphi %s1180_s17, %s1541_s17   ;;  %s1138_s16 = sphi %s1178_s16, %s1540_s16   ;;  %s1134_s15 = sphi %s1176_s15, %s1539_s15  }
   0x4   : > { %s1199_s21 = sadd.s32 1, %s1146_s18   ;;  %s24_s22 = sadd.s32 1, %s1142_s17 }
   0x5   : > { %s21_s23 = ssub.s32 %s1146_s18, %s1199_s21  ;;  %p31_p0 = scmp.ne.s32.totalorder %s1142_s17, %s1138_s16 }
   0x6   : > { %p22_p1 = scmp.eq.s32.totalorder %s21_s23, 0  ;;  %p32_p2 = scmp.eq.s32.totalorder %s1146_s18, 0 }
   0x7   : > { %p129_p3 = scmp.eq.s32.totalorder %s892_s19, 1  ;;  %p134_p4 = scmp.ne.s32.totalorder %s1138_s16, %s1134_s15 }
   0x8   : > { %s1212_s24 = scalar_select %p22_p1, %s1142_s17, %s24_s22  }
   0x9   : > { %p1214_p5 = por %p32_p2, %p31_p0  ;;  %p1218_p6 = por %p129_p3, %p31_p0 }
   0xa   : > { %p135_p7 = scmp.eq.s32.totalorder %s893_s20, 1  ;;  %p895_p9 = scmp.ge.s32.totalorder %s1146_s18, 2 }
   0xc   : > { %p1222_p8 = por %p135_p7, %p134_p4  ;;  %157 = sbr.rel (%p895_p9) target bundleno = 33 (0x21), region = 24 }
  0x11   : > { %160 = sbr.rel (!%p1214_p5) target bundleno = 25 (0x19), region = 28  ;;  %s162_s28 = sand.u32 (%p1214_p5), 1, %s1142_s17  }
  0x12   : > { %s946_s29 = sshll.u32 (%p1214_p5), %s1146_s18, 7  ;;  %s896_s30 = sshll.u32 (%p1214_p5), %s162_s28, 6 }
  0x13   : > { %s168_s7 = scalar_lea.vmem (%p1214_p5), %s1531_s0, %s946_s29  ;;  %s164_s8 = scalar_lea.vmem (%p1214_p5), [#allocation2], %s896_s30 }
  0x14   : > { %v211_v0 = vld [vmem:[%s168_s7] sm:$0xff] (%p1214_p5)  ;;  %v213_v1 = vld [vmem:[%s168_s7 + $0x10] sm:$0xff] (%p1214_p5) }
  0x15   : > { %v215_v2 = vld [vmem:[%s168_s7 + $0x20] sm:$0xff] (%p1214_p5)  ;;  %212 = vst [vmem:[%s164_s8] sm:$0xff] (%p1214_p5), %v211_v0  ;;  %214 = vst [vmem:[%s164_s8 + $0x8] sm:$0xff] (%p1214_p5), %v213_v1  ;;  %v217_v3 = vld [vmem:[%s168_s7 + $0x30] sm:$0xff] (%p1214_p5) }
  0x16   : > { %216 = vst [vmem:[%s164_s8 + $0x10] sm:$0xff] %v215_v2  ;;  %v219_v4 = vld [vmem:[%s168_s7 + $0x40] sm:$0xff]  ;;  %v221_v5 = vld [vmem:[%s168_s7 + $0x50] sm:$0xff]  ;;  %218 = vst [vmem:[%s164_s8 + $0x18] sm:$0xff] %v217_v3 }
  0x17   : > { %220 = vst [vmem:[%s164_s8 + $0x20] sm:$0xff] %v219_v4  ;;  %222 = vst [vmem:[%s164_s8 + $0x28] sm:$0xff] %v221_v5  ;;  %v223_v6 = vld [vmem:[%s168_s7 + $0x60] sm:$0xff]  ;;  %v225_v7 = vld [vmem:[%s168_s7 + $0x70] sm:$0xff] }
  0x18   : > { %224 = vst [vmem:[%s164_s8 + $0x30] sm:$0xff] %v223_v6  ;;  %226 = vst [vmem:[%s164_s8 + $0x38] sm:$0xff] %v225_v7 }
  0x19 PF: > { %232 = sbr.rel (!%p1214_p5) target bundleno = 33 (0x21), region = 66  ;;  %s234_s9 = sand.u32 (%p1214_p5), 1, %s1142_s17  }
  0x1a   : > { %s947_s10 = sshll.u32 (%p1214_p5), %s1146_s18, 7  ;;  %s900_s11 = sshll.u32 (%p1214_p5), %s234_s9, 6 }
  0x1b   : > { %s837_s14 = scalar_lea.vmem (%p1214_p5), %s1532_s1, %s947_s10  ;;  %s236_s20 = scalar_lea.vmem (%p1214_p5), [#allocation3], %s900_s11 }
  0x1c   : > { %v903_v8 = vld [vmem:[%s837_s14 + $0x8] sm:$0xff] (%p1214_p5)  ;;  %v904_v9 = vld [vmem:[%s837_s14 + $0x18] sm:$0xff] (%p1214_p5) }
  0x1d   : > { %v905_v10 = vld [vmem:[%s837_s14 + $0x28] sm:$0xff] (%p1214_p5)  ;;  %285 = vst [vmem:[%s236_s20] sm:$0xff] (%p1214_p5), %v903_v8  ;;  %287 = vst [vmem:[%s236_s20 + $0x8] sm:$0xff] (%p1214_p5), %v904_v9  ;;  %v906_v11 = vld [vmem:[%s837_s14 + $0x38] sm:$0xff] (%p1214_p5) }
  0x1e   : > { %289 = vst [vmem:[%s236_s20 + $0x10] sm:$0xff] %v905_v10  ;;  %v907_v12 = vld [vmem:[%s837_s14 + $0x48] sm:$0xff]  ;;  %v908_v13 = vld [vmem:[%s837_s14 + $0x58] sm:$0xff]  ;;  %291 = vst [vmem:[%s236_s20 + $0x18] sm:$0xff] %v906_v11 }
  0x1f   : > { %293 = vst [vmem:[%s236_s20 + $0x20] sm:$0xff] %v907_v12  ;;  %295 = vst [vmem:[%s236_s20 + $0x28] sm:$0xff] %v908_v13  ;;  %v909_v14 = vld [vmem:[%s837_s14 + $0x68] sm:$0xff]  ;;  %v910_v15 = vld [vmem:[%s837_s14 + $0x78] sm:$0xff] }
  0x20   : > { %297 = vst [vmem:[%s236_s20 + $0x30] sm:$0xff] %v909_v14  ;;  %299 = vst [vmem:[%s236_s20 + $0x38] sm:$0xff] %v910_v15 }
  0x21 PF: > { %p911_p10 = scmp.ge.s32.totalorder %s1146_s18, 1  ;;  %p304_p11 = scmp.lt.s32.totalorder %s1146_s18, 3 }
  0x23   : > { %p305_p12 = pnand %p911_p10, %p304_p11 }
  0x24   : > { %s311_s22 = sand.u32 (!%p305_p12), 1, %s1138_s16   ;;  %s1148_s13 = smov (!%p305_p12), [#allocation4]  }
  0x25   : > { %308 = sbr.rel (%p305_p12) target bundleno = 458 (0x1ca), region = 104  ;;  %s1248_s23 = sshll.u32 (!%p305_p12), %s311_s22, 6 }
  0x26   : > { %s1251_s25 = scalar_lea.vmem (!%p305_p12), [#allocation2], %s1248_s23  ;;  %s1257_s28 = scalar_lea.vmem (!%p305_p12), [#allocation3], %s1248_s23 }
  0x27   : > { %s1468_s7 = scalar_lea.vmem (!%p305_p12), [#allocation4], %s1248_s23  ;;  %s956_s23 = sshll.u32 (!%p305_p12), %s892_s19, 10 }
  0x28   : > { %s805_s8 = sshll.u32 (!%p305_p12), %s1468_s7, 4  ;;  %s1483_s11 = scalar_lea.hbm (!%p305_p12), %s1535_s4, %s956_s23  ;;  %s1485_s8 = int_to_ptr.vmem [resolvable:$true] %s805_s8 }
  0x29   : > { %s1490_s12 = scalar_lea.sflag (!%p305_p12), [#allocation5], %s311_s22  ;;  %s1086_s19 = scalar_lea.vmem (!%p305_p12), %s1485_s8, 1024 }
  0x2a   : > { %v1254_v16 = vld [vmem:[%s1251_s25 + $0x20] sm:$0xff]  ;;  %v1271_v21 = vld [vmem:[%s1251_s25 + $0x28] sm:$0xff]  ;;  %v1305_v38 = vld [vmem:[%s1251_s25 + $0x18] sm:$0xff]  ;;  %p1087_p13 = scmp.ne.s32.totalorder %s1485_s8, %s1086_s19  ;;  %s1090_s14 = sshll.u32 %s1148_s13, 4  ;;  %s1091_s14 = int_to_ptr.vmem [resolvable:$false] %s1090_s14 }
  0x2b   : > { %v1260_v17 = vld [vmem:[%s1257_s28 + $0x20] sm:$0xff]  ;;  %v1274_v22 = vld [vmem:[%s1257_s28 + $0x28] sm:$0xff]  ;;  %v396_v33 = vmul.f32 %v1271_v21, %v1271_v21  ;;  %v395_v36 = vmul.f32 %v1254_v16, %v1254_v16  ;;  %v1308_v39 = vld [vmem:[%s1257_s28 + $0x18] sm:$0xff]  ;;  %v394_v53 = vmul.f32 %v1305_v38, %v1305_v38  ;;  %s1092_s20 = scalar_lea.vmem %s1091_s14, 2048  ;;  %p1093_p2 = scmp.lt.s32.totalorder %s1485_s8, %s1091_s14 }
  0x2c   : > { %v1263_v18 = vld [vmem:[%s1251_s25] sm:$0xff]  ;;  %v371_v19 = vadd.f32 %v1260_v17, %v1254_v16  ;;  %v1279_v24 = vld [vmem:[%s1251_s25 + $0x8] sm:$0xff]  ;;  %v372_v26 = vadd.f32 %v1274_v22, %v1271_v21  ;;  %v404_v34 = vmul.f32 %v1274_v22, %v1274_v22  ;;  %v403_v37 = vmul.f32 %v1260_v17, %v1260_v17  ;;  %v1311_v41 = vld [vmem:[%s1251_s25 + $0x10] sm:$0xff]  ;;  %p1088_p0 = pnand %p1087_p13, %p1218_p6  ;;  %p1094_p3 = scmp.lt.s32.totalorder %s1092_s20, %s1086_s19 }
  0x2d   : > { %v1268_v20 = vld [vmem:[%s1257_s28] sm:$0xff]  ;;  %v1282_v25 = vld [vmem:[%s1257_s28 + $0x8] sm:$0xff]  ;;  %v392_v27 = vmul.f32 %v1279_v24, %v1279_v24  ;;  %v391_v30 = vmul.f32 %v1263_v18, %v1263_v18  ;;  %v1314_v42 = vld [vmem:[%s1257_s28 + $0x10] sm:$0xff]  ;;  %v370_v44 = vadd.f32 %v1308_v39, %v1305_v38  ;;  %v402_v54 = vmul.f32 %v1308_v39, %v1308_v39 }
  0x2e   : > { %v367_v23 = vadd.f32 %v1268_v20, %v1263_v18  ;;  %383 = vadd.xlane.f32.xlu1 %v371_v19  ;;  %v400_v28 = vmul.f32 %v1282_v25, %v1282_v25  ;;  %v368_v29 = vadd.f32 %v1282_v25, %v1279_v24  ;;  %v399_v31 = vmul.f32 %v1268_v20, %v1268_v20  ;;  %v1054_v45 = vld [vmem:[%s1533_s2 + $0x78] sm:$0xff]   ;;  %v1333_v50 = vld [vmem:[%s1251_s25 + $0x30] sm:$0xff]  ;;  %v1058_v63 = vld [vmem:[%s1533_s2 + $0x68] sm:$0xff]   ;;  %p1089_p1 = pneg %p1088_p0  ;;  %p1095_p4 = por %p1094_p3, %p1093_p2 }
  0x2f   : > { %v412_v40 = vadd.f32 %v404_v34, %v396_v33  ;;  %v411_v43 = vadd.f32 %v403_v37, %v395_v36  ;;  %v369_v46 = vadd.f32 %v1314_v42, %v1311_v41  ;;  %v1324_v47 = vld [vmem:[%s1251_s25 + $0x38] sm:$0xff]  ;;  %v1336_v51 = vld [vmem:[%s1257_s28 + $0x30] sm:$0xff]  ;;  %957 = vmatprep.subr.bf16.mxu0 %v1054_v45  ;;  %997 = vmatprep.subr.bf16.mxu1 %v1054_v45  ;;  %v1059_v3 = vld [vmem:[%s1533_s2 + $0x28] sm:$0xff]  }
  0x30   : > { %375 = vadd.xlane.f32.xlu0 %v367_v23  ;;  %v408_v32 = vadd.f32 %v400_v28, %v392_v27  ;;  %v407_v35 = vadd.f32 %v399_v31, %v391_v30  ;;  %v1327_v48 = vld [vmem:[%s1257_s28 + $0x38] sm:$0xff]  ;;  %v1056_v55 = vld [vmem:[%s1533_s2 + $0x70] sm:$0xff]   ;;  %v373_v56 = vadd.f32 %v1336_v51, %v1333_v50  ;;  %v393_v57 = vmul.f32 %v1311_v41, %v1311_v41  ;;  %v1060_v5 = vld [vmem:[%s1533_s2 + $0x60] sm:$0xff]   ;;  %p1096_p5 = pnand %p1095_p4, %p1089_p1 }
  0x31   : > { %v1055_v49 = vld [vmem:[%s1533_s2 + $0x38] sm:$0xff]   ;;  %v374_v52 = vadd.f32 %v1327_v48, %v1324_v47  ;;  %v401_v58 = vmul.f32 %v1314_v42, %v1314_v42  ;;  %v1057_v59 = vld [vmem:[%s1533_s2 + $0x30] sm:$0xff]   ;;  %v410_v60 = vadd.f32 %v402_v54, %v394_v53  ;;  %v398_v61 = vmul.f32 %v1324_v47, %v1324_v47  ;;  %v1061_v7 = vld [vmem:[%s1533_s2 + $0x20] sm:$0xff]  }
  0x32   : > { %385 = vadd.xlane.f32.xlu1 %v372_v26  ;;  %958 = vmatpush3.bf16.msra.mxu0 %v1055_v49  ;;  %v406_v62 = vmul.f32 %v1327_v48, %v1327_v48  ;;  %v397_v1 = vmul.f32 %v1333_v50, %v1333_v50  ;;  %v405_v2 = vmul.f32 %v1336_v51, %v1336_v51  ;;  %v1062_v8 = vld [vmem:[%s1533_s2 + $0x58] sm:$0xff]   ;;  %v1064_v10 = vld [vmem:[%s1533_s2 + $0x50] sm:$0xff]   ;;  %v1066_v12 = vld [vmem:[%s1533_s2 + $0x48] sm:$0xff]  }
  0x33   : > { %1005 = vmatpush3.bf16.msra.mxu1 %v1055_v49  ;;  %959 = vmatprep.subr.bf16.mxu0 %v1056_v55  ;;  %v409_v0 = vadd.f32 %v401_v58, %v393_v57  ;;  %v1063_v9 = vld [vmem:[%s1533_s2 + $0x18] sm:$0xff]   ;;  %v1065_v11 = vld [vmem:[%s1533_s2 + $0x10] sm:$0xff]   ;;  %v1067_v13 = vld [vmem:[%s1533_s2 + $0x8] sm:$0xff]  }
  0x34   : > { %377 = vadd.xlane.f32.xlu0 %v368_v29  ;;  %998 = vmatprep.subr.bf16.mxu1 %v1056_v55  ;;  %v414_v4 = vadd.f32 %v406_v62, %v398_v61  ;;  %v413_v6 = vadd.f32 %v405_v2, %v397_v1  ;;  %v1068_v14 = vld [vmem:[%s1533_s2 + $0x40] sm:$0xff]  }
  0x35   : > { %v1069_v15 = vld [vmem:[%s1533_s2] sm:$0xff]  }
  0x36   : > { %417 = vadd.xlane.f32.xlu1 %v408_v32  ;;  %960 = vmatpush3.bf16.msra.mxu0 %v1057_v59 }
  0x37   : > { %1006 = vmatpush3.bf16.msra.mxu1 %v1057_v59  ;;  %961 = vmatprep.subr.bf16.mxu0 %v1058_v63 }
  0x38   : > { %415 = vadd.xlane.f32.xlu0 %v407_v35  ;;  %999 = vmatprep.subr.bf16.mxu1 %v1058_v63 }
  0x3a   : > { %425 = vadd.xlane.f32.xlu1 %v412_v40  ;;  %962 = vmatpush3.bf16.msra.mxu0 %v1059_v3 }
  0x3b   : > { %1007 = vmatpush3.bf16.msra.mxu1 %v1059_v3  ;;  %963 = vmatprep.subr.bf16.mxu0 %v1060_v5 }
  0x3c   : > { %423 = vadd.xlane.f32.xlu0 %v411_v43  ;;  %1000 = vmatprep.subr.bf16.mxu1 %v1060_v5 }
  0x3e   : > { %381 = vadd.xlane.f32.xlu1 %v370_v44  ;;  %964 = vmatpush3.bf16.msra.mxu0 %v1061_v7 }
  0x3f   : > { %1008 = vmatpush3.bf16.msra.mxu1 %v1061_v7  ;;  %965 = vmatprep.subr.bf16.mxu0 %v1062_v8 }
  0x40   : > { %379 = vadd.xlane.f32.xlu0 %v369_v46  ;;  %1001 = vmatprep.subr.bf16.mxu1 %v1062_v8 }
  0x42   : > { %389 = vadd.xlane.f32.xlu1 %v374_v52  ;;  %966 = vmatpush3.bf16.msra.mxu0 %v1063_v9 }
  0x43   : > { %1009 = vmatpush3.bf16.msra.mxu1 %v1063_v9  ;;  %967 = vmatprep.subr.bf16.mxu0 %v1064_v10 }
  0x44   : > { %387 = vadd.xlane.f32.xlu0 %v373_v56  ;;  %1002 = vmatprep.subr.bf16.mxu1 %v1064_v10 }
  0x46   : > { %421 = vadd.xlane.f32.xlu1 %v410_v60  ;;  %968 = vmatpush3.bf16.msra.mxu0 %v1065_v11 }
  0x47   : > { %1010 = vmatpush3.bf16.msra.mxu1 %v1065_v11  ;;  %969 = vmatprep.subr.bf16.mxu0 %v1066_v12 }
  0x48   : > { %419 = vadd.xlane.f32.xlu0 %v409_v0  ;;  %1003 = vmatprep.subr.bf16.mxu1 %v1066_v12 }
  0x4a   : > { %429 = vadd.xlane.f32.xlu1 %v414_v4  ;;  %970 = vmatpush3.bf16.msra.mxu0 %v1067_v13 }
  0x4b   : > { %1011 = vmatpush3.bf16.msra.mxu1 %v1067_v13  ;;  %971 = vmatprep.subr.bf16.mxu0 %v1068_v14 }
  0x4c   : > { %427 = vadd.xlane.f32.xlu0 %v413_v6  ;;  %1004 = vmatprep.subr.bf16.mxu1 %v1068_v14 }
  0x4e   : > { %972 = vmatpush3.bf16.msra.mxu0 %v1069_v15 }
  0x4f   : > { %1012 = vmatpush3.bf16.msra.mxu1 %v1069_v15 }
  0xb7   : > { %v384_v19 = vpop.xlane.xlu1 %383 }
  0xb8   : > { %v1408_v35 = vmul.f32 0.00390625, %v384_v19 }
  0xb9   : > { %v376_v23 = vpop.xlane.xlu0 %375 }
  0xba   : > { %v1400_v28 = vmul.f32 0.00390625, %v376_v23  ;;  %v451_v54 = vmul.f32 %v1408_v35, %v1408_v35  ;;  %v491_v14 = vsub.f32 %v1254_v16, %v1408_v35 }
  0xbb   : > { %v386_v26 = vpop.xlane.xlu1 %385 }
  0xbc   : > { %v1404_v31 = vmul.f32 0.00390625, %v386_v26  ;;  %v447_v36 = vmul.f32 %v1400_v28, %v1400_v28  ;;  %v487_v19 = vsub.f32 %v1263_v18, %v1400_v28 }
  0xbd   : > { %v378_v27 = vpop.xlane.xlu0 %377 }
  0xbe   : > { %v1402_v29 = vmul.f32 0.00390625, %v378_v27  ;;  %v452_v46 = vmul.f32 %v1404_v31, %v1404_v31 }
  0xbf   : > { %v418_v30 = vpop.xlane.xlu1 %417 }
  0xc0   : > { %v440_v32 = vmul.f32 0.00390625, %v418_v30  ;;  %v448_v33 = vmul.f32 %v1402_v29, %v1402_v29  ;;  %v488_v23 = vsub.f32 %v1279_v24, %v1402_v29  ;;  %v515_v30 = vsub.f32 %v1260_v17, %v1408_v35 }
  0xc1   : > { %v416_v34 = vpop.xlane.xlu0 %415  ;;  %v512_v16 = vsub.f32 %v1282_v25, %v1402_v29  ;;  %v492_v25 = vsub.f32 %v1271_v21, %v1404_v31 }
  0xc2   : > { %v439_v37 = vmul.f32 0.00390625, %v416_v34  ;;  %v456_v40 = vsub.f32 %v440_v32, %v448_v33 }
  0xc3   : > { %v426_v44 = vpop.xlane.xlu1 %425 }
  0xc4   : > { %v455_v43 = vsub.f32 %v439_v37, %v447_v36  ;;  %v464_v45 = vmax.f32 %v456_v40, 0.0  ;;  %v444_v49 = vmul.f32 0.00390625, %v426_v44 }
  0xc5   : > { %v424_v52 = vpop.xlane.xlu0 %423 }
  0xc6   : > { %v463_v53 = vmax.f32 %v455_v43, 0.0  ;;  %v443_v55 = vmul.f32 0.00390625, %v424_v52  ;;  %v472_v56 = vadd.f32 1e-05, %v464_v45  ;;  %v460_v57 = vsub.f32 %v444_v49, %v452_v46 }
  0xc7   : > { %v382_v60 = vpop.xlane.xlu1 %381  ;;  %v511_v43 = vsub.f32 %v1268_v20, %v1400_v28 }
  0xc8   : > { %v471_v58 = vadd.f32 1e-05, %v463_v53  ;;  %v459_v59 = vsub.f32 %v443_v55, %v451_v54  ;;  %1070 = vrsqrt.f32 %v472_v56  ;;  %v468_v61 = vmax.f32 %v460_v57, 0.0 }
  0xc9   : > { %v380_v62 = vpop.xlane.xlu0 %379  ;;  %v1416_v3 = vmul.f32 0.00390625, %v382_v60  ;;  %v516_v55 = vsub.f32 %v1274_v22, %v1404_v31 }
  0xca   : > { %1072 = vrsqrt.f32 %v471_v58  ;;  %v467_v63 = vmax.f32 %v459_v59, 0.0  ;;  %v476_v0 = vadd.f32 1e-05, %v468_v61  ;;  %v1418_v5 = vmul.f32 0.00390625, %v380_v62 }
  0xcb   : > { %v390_v2 = vpop.xlane.xlu1 %389  ;;  %v450_v8 = vmul.f32 %v1416_v3, %v1416_v3  ;;  %v490_v22 = vsub.f32 %v1305_v38, %v1416_v3  ;;  %v514_v31 = vsub.f32 %v1308_v39, %v1416_v3 }
  0xcc   : > { %v475_v1 = vadd.f32 1e-05, %v467_v63  ;;  %1074 = vrsqrt.f32 %v476_v0  ;;  %v1420_v7 = vmul.f32 0.00390625, %v390_v2  ;;  %v449_v12 = vmul.f32 %v1418_v5, %v1418_v5 }
  0xcd   : > { %v388_v4 = vpop.xlane.xlu0 %387 }
  0xce   : > { %1076 = vrsqrt.f32 %v475_v1  ;;  %v1424_v11 = vmul.f32 0.00390625, %v388_v4  ;;  %v454_v33 = vmul.f32 %v1420_v7, %v1420_v7  ;;  %v489_v4 = vsub.f32 %v1311_v41, %v1418_v5 }
  0xcf   : > { %v422_v6 = vpop.xlane.xlu1 %421  ;;  %v518_v38 = vsub.f32 %v1327_v48, %v1420_v7 }
  0xd0   : > { %v442_v9 = vmul.f32 0.00390625, %v422_v6  ;;  %v453_v18 = vmul.f32 %v1424_v11, %v1424_v11  ;;  %v513_v6 = vsub.f32 %v1314_v42, %v1418_v5  ;;  %v493_v39 = vsub.f32 %v1333_v50, %v1424_v11  ;;  %v915_v50 = vld [vmem:[%s1534_s3] ss:$0 sm:$0xff] }
  0xd1   : > { %v420_v10 = vpop.xlane.xlu0 %419  ;;  %v517_v41 = vsub.f32 %v1336_v51, %v1424_v11 }
  0xd2   : > { %v441_v13 = vmul.f32 0.00390625, %v420_v10  ;;  %v458_v15 = vsub.f32 %v442_v9, %v450_v8 }
  0xd3   : > { %v430_v27 = vpop.xlane.xlu1 %429 }
  0xd4   : > { %v457_v26 = vsub.f32 %v441_v13, %v449_v12  ;;  %v466_v32 = vmax.f32 %v458_v15, 0.0  ;;  %v446_v34 = vmul.f32 0.00390625, %v430_v27 }
  0xd5   : > { %v428_v36 = vpop.xlane.xlu0 %427  ;;  %v1071_v37 = vpop.eup %1070 }
  0xd6   : > { %v465_v40 = vmax.f32 %v457_v26, 0.0  ;;  %v445_v24 = vmul.f32 0.00390625, %v428_v36  ;;  %v474_v17 = vadd.f32 1e-05, %v466_v32  ;;  %v462_v35 = vsub.f32 %v446_v34, %v454_v33 }
  0xd7   : > { %v1073_v44 = vpop.eup %1072  ;;  %v520_v45 = vmul.f32 %v1071_v37, %v512_v16  ;;  %v496_v46 = vmul.f32 %v1071_v37, %v488_v23 }
  0xd8   : > { %v473_v49 = vadd.f32 1e-05, %v465_v40  ;;  %v461_v52 = vsub.f32 %v445_v24, %v453_v18  ;;  %v519_v53 = vmul.f32 %v1073_v44, %v511_v43  ;;  %v495_v54 = vmul.f32 %v1073_v44, %v487_v19 }
  0xd9   : > { %1078 = vrsqrt.f32 %v474_v17  ;;  %v470_v29 = vmax.f32 %v462_v35, 0.0  ;;  %v1075_v56 = vpop.eup %1074 }
  0xda   : > { %1080 = vrsqrt.f32 %v473_v49  ;;  %v469_v20 = vmax.f32 %v461_v52, 0.0  ;;  %v949_v28 = vpack.c.bf16 %v520_v45, %v519_v53  ;;  %v948_v57 = vpack.c.bf16 %v496_v46, %v495_v54 }
  0xdb   : > { %v1077_v58 = vpop.eup %1076  ;;  %v478_v59 = vadd.f32 1e-05, %v470_v29  ;;  %v524_v60 = vmul.f32 %v1075_v56, %v516_v55  ;;  %v500_v61 = vmul.f32 %v1075_v56, %v492_v25 }
  0xdc   : > { %v477_v62 = vadd.f32 1e-05, %v469_v20  ;;  %750 = vmatprep.mubr.bf16.mxu0 %v949_v28  ;;  %v523_v63 = vmul.f32 %v1077_v58, %v515_v30  ;;  %v499_v0 = vmul.f32 %v1077_v58, %v491_v14  ;;  %v494_v14 = vsub.f32 %v1324_v47, %v1420_v7 }
  0xdd   : > { %1082 = vrsqrt.f32 %v478_v59  ;;  %751 = vmatmul.mubr.bf16.vlgmr.msra.gmra.mxu0 %v948_v57 }
  0xde   : > { %1084 = vrsqrt.f32 %v477_v62  ;;  %v953_v21 = vpack.c.bf16 %v524_v60, %v523_v63  ;;  %v952_v1 = vpack.c.bf16 %v500_v61, %v499_v0 }
  0xe0   : > { %766 = vmatprep.mubr.bf16.mxu1 %v953_v21 }
  0xe1   : > { %767 = vmatmul.mubr.bf16.vlgmr.msra.gmra.mxu1 %v952_v1 }
  0xe6   : > { %v1079_v2 = vpop.eup %1078 }
  0xe7   : > { %v1081_v8 = vpop.eup %1080  ;;  %v522_v9 = vmul.f32 %v1079_v2, %v514_v31  ;;  %v498_v10 = vmul.f32 %v1079_v2, %v490_v22 }
  0xe8   : > { %v521_v12 = vmul.f32 %v1081_v8, %v513_v6  ;;  %v497_v13 = vmul.f32 %v1081_v8, %v489_v4 }
  0xea   : > { %v1083_v15 = vpop.eup %1082  ;;  %v951_v3 = vpack.c.bf16 %v522_v9, %v521_v12  ;;  %v950_v42 = vpack.c.bf16 %v498_v10, %v497_v13 }
  0xeb   : > { %v1085_v5 = vpop.eup %1084  ;;  %v526_v19 = vmul.f32 %v1083_v15, %v518_v38  ;;  %v502_v23 = vmul.f32 %v1083_v15, %v494_v14 }
  0xec   : > { %758 = vmatprep.mubr.bf16.mxu0 %v951_v3  ;;  %v525_v26 = vmul.f32 %v1085_v5, %v517_v41  ;;  %v501_v27 = vmul.f32 %v1085_v5, %v493_v39 }
  0xed   : > { %759 = vmatmul.mubr.bf16.gmra.mxu0 %v950_v42 }
  0xee   : > { %v955_v47 = vpack.c.bf16 %v526_v19, %v525_v26  ;;  %v954_v30 = vpack.c.bf16 %v502_v23, %v501_v27 }
  0xf0   : > { %774 = vmatprep.mubr.bf16.mxu1 %v955_v47 }
  0xf1   : > { %775 = vmatmul.mubr.bf16.gmra.mxu1 %v954_v30 }
 0x19d   : > { %v973_v48 = vpop.f32.mrf.mxu0 }
 0x19f   : > { %v974_v51 = vpop.f32.mrf.mxu0 }
 0x1a0   : > { %v975_v7 = vadd.f32 %v974_v51, %v973_v48 }
 0x1a1   : > { %v976_v11 = vpop.f32.mrf.mxu0  ;;  %v985_v32 = vpop.f32.mrf.mxu1 }
 0x1a2   : > { %v753_v33 = vadd.f32 %v975_v7, %v915_v50 }
 0x1a3   : > { %v977_v34 = vpop.f32.mrf.mxu0  ;;  %v986_v36 = vpop.f32.mrf.mxu1 }
 0x1a4   : > { %783 = vst [vmem:[%s1468_s7] sm:$0xff] %v753_v33  ;;  %v978_v16 = vadd.f32 %v977_v34, %v976_v11  ;;  %v987_v37 = vadd.f32 %v986_v36, %v985_v32 }
 0x1a5   : > { %v988_v40 = vpop.f32.mrf.mxu1 }
 0x1a6   : > { %v756_v18 = vadd.f32 %v978_v16, %v915_v50  ;;  %v769_v24 = vadd.f32 %v987_v37, %v915_v50 }
 0x1a7   : > { %v989_v43 = vpop.f32.mrf.mxu1 }
 0x1a8   : > { %784 = vst [vmem:[%s1468_s7 + $0x8] sm:$0xff] %v756_v18  ;;  %787 = vst [vmem:[%s1468_s7 + $0x20] sm:$0xff] %v769_v24  ;;  %v990_v44 = vadd.f32 %v989_v43, %v988_v40 }
 0x1aa   : > { %v772_v17 = vadd.f32 %v990_v44, %v915_v50 }
 0x1ac   : > { %788 = vst [vmem:[%s1468_s7 + $0x28] sm:$0xff] %v772_v17 }
 0x1ad   : > { %v979_v35 = vpop.f32.mrf.mxu0 }
 0x1af   : > { %v980_v45 = vpop.f32.mrf.mxu0 }
 0x1b0   : > { %v981_v46 = vadd.f32 %v980_v45, %v979_v35 }
 0x1b1   : > { %v982_v49 = vpop.f32.mrf.mxu0  ;;  %v991_v52 = vpop.f32.mrf.mxu1 }
 0x1b2   : > { %v761_v53 = vadd.f32 %v981_v46, %v915_v50 }
 0x1b3   : > { %v983_v54 = vpop.f32.mrf.mxu0  ;;  %v992_v25 = vpop.f32.mrf.mxu1 }
 0x1b4   : > { %785 = vst [vmem:[%s1468_s7 + $0x10] sm:$0xff] %v761_v53  ;;  %v984_v29 = vadd.f32 %v983_v54, %v982_v49  ;;  %v993_v55 = vadd.f32 %v992_v25, %v991_v52 }
 0x1b5   : > { %v994_v56 = vpop.f32.mrf.mxu1 }
 0x1b6   : > { %v764_v20 = vadd.f32 %v984_v29, %v915_v50  ;;  %v777_v28 = vadd.f32 %v993_v55, %v915_v50 }
 0x1b7   : > { %v995_v57 = vpop.f32.mrf.mxu1 }
 0x1b8   : > { %786 = vst [vmem:[%s1468_s7 + $0x18] sm:$0xff] %v764_v20  ;;  %789 = vst [vmem:[%s1468_s7 + $0x30] sm:$0xff] %v777_v28  ;;  %v996_v58 = vadd.f32 %v995_v57, %v994_v56 }
 0x1ba   : > { %v780_v59 = vadd.f32 %v996_v58, %v915_v50 }
 0x1bc   : > { %790 = vst [vmem:[%s1468_s7 + $0x38] sm:$0xff] %v780_v59 }
 0x1bd   : > { %1099 = shalt.err (!%p1096_p5)
}
 0x1be   : > { %s1100_s22 = scalar_lea.hbm %s1483_s11, 1024  ;;  %s1104_s29 = scalar_lea.hbm %s1535_s4, 2048 }
 0x1bf   : > { %p1101_p7 = scmp.ne.s32.totalorder %s1483_s11, %s1100_s22  ;;  %p1105_p12 = scmp.lt.s32.totalorder %s1483_s11, %s1535_s4 }
 0x1c0   : > { %p1106_p13 = scmp.lt.s32.totalorder %s1104_s29, %s1100_s22 }
 0x1c1   : > { %p1102_p10 = pnand %p1101_p7, %p1218_p6 }
 0x1c2   : > { %p1107_p0 = por %p1106_p13, %p1105_p12 }
 0x1c3   : > { %p1103_p11 = pneg %p1102_p10 }
 0x1c5   : > { %p1108_p1 = pnand %p1107_p0, %p1103_p11 }
 0x1c7   : > { %1111 = shalt.err (!%p1108_p1)
}
 0x1c8   : > { %s1149_s6 = smov 128   ;;  %s1150_s7 = smov 8  }
 0x1c9   : > { %1013 = dma.vmem_to_hbm [thread:$0]  (%p1218_p6), %s1485_s8, 1024, %s1483_s11, %s1490_s12, %s1149_s6, %s1149_s6, %s1150_s7  }
 0x1ca PF: > { %s820_s23 = sand.u32 1, %s1134_s15   ;;  %p1016_p2 = pnand %p895_p9, %p1222_p8 }
 0x1cb   : > { %s821_s9 = scalar_lea.sflag [#allocation5], %s820_s23 }
 0x1cc   : > { %p1017_p3 = pneg %p1016_p2 }
 0x1ce   : > { %1129 = dma.done.wait (%p1017_p3), %s821_s9, 1024  }
 0x1cf   : > { %1131 = vsyncadd (%p1017_p3), %s821_s9, 4294966272  ;;  %p14_p4 = scmp.ge.s32.totalorder %s1199_s21, 4   ;;  %s1539_s15 = smov %s1138_s16 }
 0x1d0   : > { %s1540_s16 = smov %s1142_s17  ;;  %s1541_s17 = smov %s1212_s24 }
 0x1d1   : > { %s1542_s18 = smov %s1199_s21  ;;  %16 = sbr.rel (!%p14_p4) target bundleno = 3 (0x3), region = 160 }
 0x1d6   :  { %826 = vsyncpa [#allocation5], 1 }
 0x1d7   :  { %828 = vsyncpa [#allocation5 + $0x1], 1 }

</bundles_post_ra>
